<compile_context>
chip_gen: v7x
topology: tpu7x:2x2x1
jax: 0.10.0
libtpu: 0.0.40
codegen_flags: <defaults>
</compile_context>

<pallas_src>
import jax
import jax.numpy as jnp
from jax.experimental import pallas as pl
from jax.experimental.pallas import tpu as pltpu


# ---- cheap sin^2 building blocks (f32) --------------------------------------
_INV_PI = 0.3183098861837907          # 1/pi
_PI_HI = 3.140625                     # high part of pi (exact, few mantissa bits)
_PI_LO = 9.6765358979323846e-4        # pi - _PI_HI
_S3 = -1.0 / 6.0                      # Taylor coefficients of sin about 0
_S5 = 1.0 / 120.0
_S7 = -1.0 / 5040.0
_S9 = 1.0 / 362880.0
_S11 = -1.0 / 39916800.0


def _snake_kernel(x_ref, alpha_ref, o_ref):
    # x_ref / o_ref: (tc, tt) block, lane-dense along the time axis.
    # alpha_ref:     (tc, 1) f32, resident across the (inner) time-tile axis.
    x = x_ref[...].astype(jnp.float32)
    a = alpha_ref[...]
    inv_a = 1.0 / (a + 1e-9)           # exact f32 divide on tc elems: negligible

    z = a * x
    # Range reduction modulo pi (sin^2 has period pi): r in [-pi/2, pi/2].
    k = jnp.floor(z * _INV_PI + 0.5)
    r = z - k * _PI_HI
    r = r - k * _PI_LO
    # sin(r) via an odd Taylor polynomial (Horner on r^2); truncation error
    # (pi/2)^13/13! ~ 5.7e-8 -- below f32 noise for this activation.
    r2 = r * r
    p = _S11
    p = p * r2 + _S9
    p = p * r2 + _S7
    p = p * r2 + _S5
    p = p * r2 + _S3
    s = r + (r * r2) * p               # keeps the leading term exact
    o_ref[...] = (x + inv_a * (s * s)).astype(o_ref.dtype)


def _vmem_budget_bytes() -> int:
    """VMEM budget (bytes) for the double-buffered x + out tiles."""
    try:
        cap = int(pltpu.get_tpu_info().vmem_capacity_bytes)
    except Exception:
        cap = 64 * 1024 * 1024         # conservative fallback (v7x per-TC physical)
    # ~1/3 of physical VMEM, capped; leaves headroom for alpha blocks,
    # semaphores and compiler scratch.  v7x: ~21 MiB, v5e/v6e: ~42 MiB.
    return min(cap // 3, 48 * 1024 * 1024)


def _select_tiles(rows: int, time: int, itemsize: int, budget: int):
    """Pick (tc, tt): maximize the lane (time) tile first, then the row tile.

    Double-buffered x + out tiles cost 4 * tc * tt * itemsize bytes.
    tc must be a multiple of 8 (or == rows); tt a multiple of 128 (or == time).
    """
    base_tc = rows if rows < 8 else 8
    if 4 * base_tc * time * itemsize <= budget:
        tt = time                                   # full-T rows: one contiguous DMA per block
        tc_cap = budget // (4 * time * itemsize)
        if tc_cap >= rows:
            tc = rows
        else:
            tc = max(8, (tc_cap // 8) * 8)
            tc = min(tc, 256)                       # keep several row tiles for pipelining / 2-TC split
    else:
        tc = base_tc
        tt_cap = budget // (4 * tc * itemsize)
        tt = max(128, (tt_cap // 128) * 128)
        if tt >= time:
            tt = time
    return tc, tt


def snake(x: jax.Array, alpha: jax.Array, *, donate_x: bool = False,
          tile_rows: int | None = None, tile_time: int | None = None) -> jax.Array:
    """Snake activation: x + 1/(alpha+1e-9) * sin(alpha*x)^2, per-channel alpha.

    x: (B, C, T) (PyTorch NCW for 1D audio), alpha: (C, 1).
    Pass bf16 `x` to halve HBM traffic; math is done in f32 internally.
    """
    B, C, T = x.shape
    assert alpha.shape == (C, 1), alpha.shape

    # Flatten (B, C) -> one row axis (free in row-major layout): keeps a large
    # parallel grid extent even for B == 1 and packs sublanes when C < 8.
    rows = B * C
    x2 = x.reshape(rows, T)
    alpha2 = jnp.tile(alpha.astype(jnp.float32), (B, 1))     # (rows, 1), tiny

    itemsize = x.dtype.itemsize
    budget = _vmem_budget_bytes()
    tc, tt = _select_tiles(rows, T, itemsize, budget)
    if tile_rows is not None:
        tc = tile_rows
    if tile_time is not None:
        tt = tile_time

    # Time-tile axis innermost: alpha block stays resident, x/out blocks stream
    # contiguously along T within a row block.
    grid = (pl.cdiv(rows, tc), pl.cdiv(T, tt))

    flops = 25 * rows * T                          # poly sin^2 + snake epilogue (all VALU)
    bytes_accessed = 2 * rows * T * itemsize + alpha2.size * 4

    out2 = pl.pallas_call(
        _snake_kernel,
        out_shape=jax.ShapeDtypeStruct((rows, T), x.dtype),
        grid_spec=pltpu.PrefetchScalarGridSpec(
            num_scalar_prefetch=0,
            grid=grid,
            in_specs=[
                pl.BlockSpec((tc, tt), lambda r, t: (r, t)),
                # Per-row alpha: block index constant along the inner time axis
                # -> no re-DMA between consecutive grid steps.
                pl.BlockSpec((tc, 1), lambda r, t: (r, 0)),
            ],
            out_specs=pl.BlockSpec((tc, tt), lambda r, t: (r, t)),
        ),
        compiler_params=pltpu.CompilerParams(
            dimension_semantics=("parallel", "parallel"),
            vmem_limit_bytes=int(budget + (8 << 20)),
        ),
        cost_estimate=pl.CostEstimate(
            flops=int(flops), transcendentals=0, bytes_accessed=int(bytes_accessed)),
        input_output_aliases=({0: 0} if donate_x else {}),
    )(x2, alpha2)
    return out2.reshape(B, C, T)


def _reference(x, alpha):
    alpha = alpha.astype(jnp.float32)
    xf = x.astype(jnp.float32)
    out = xf + (1.0 / (alpha + 1e-9)) * jnp.sin(alpha * xf) ** 2
    return out.astype(x.dtype)


if __name__ == "__main__":
    key = jax.random.PRNGKey(0)
    k1, k2, k3 = jax.random.split(key, 3)

    # 1) Small shape implied by the module, with the module's ones-init alpha.
    B, C, T = 2, 4, 16
    x = jax.random.normal(k1, (B, C, T), dtype=jnp.float32)
    alpha = jnp.ones((C, 1), dtype=jnp.float32)
    out = jax.block_until_ready(snake(x, alpha))
    ref = _reference(x, alpha)
    assert out.shape == ref.shape and out.dtype == ref.dtype
    assert jnp.allclose(out, ref, atol=1e-5, rtol=1e-5), "small-shape mismatch"

    # 2) Non-aligned shape with forced small tiles: exercises masked partial
    #    blocks on both the row axis (B*C=10 vs tc=8) and the time axis
    #    (T=300 vs tt=128), plus a wide alpha*x range for the mod-pi reduction.
    B2, C2, T2 = 2, 5, 300
    x2 = 6.0 * jax.random.normal(k2, (B2, C2, T2), dtype=jnp.float32)
    alpha2 = jax.random.uniform(k3, (C2, 1), dtype=jnp.float32,
                                minval=0.5, maxval=2.0)
    out2 = jax.block_until_ready(snake(x2, alpha2, tile_rows=8, tile_time=128))
    ref2 = _reference(x2, alpha2)
    assert jnp.allclose(out2, ref2, atol=2e-5, rtol=2e-5), "tiled-shape mismatch"

    print("KERNEL_OK")
</pallas_src>

<mosaic_0001>
module attributes {stable_mosaic.version = 11 : i64} {
  func.func @_snake_kernel(%arg0: i32, %arg1: i32, %arg2: memref<8x16xf32, #tpu.memory_space<vmem>>, %arg3: memref<8x1xf32, #tpu.memory_space<vmem>>, %arg4: memref<8x16xf32, #tpu.memory_space<vmem>>) attributes {dimension_semantics = [#tpu.dimension_semantics<parallel>, #tpu.dimension_semantics<parallel>], iteration_bounds = array<i64: 1, 1>, scalar_prefetch = 0 : i64, scratch_operands = 0 : i64, tpu.core_type = #tpu.core_type<tc>, window_params = [{transform_indices = @transform_0, window_bounds = array<i64: 8, 16>}, {transform_indices = @transform_1, window_bounds = array<i64: 8, 1>}, {transform_indices = @transform_2, window_bounds = array<i64: 8, 16>}]} {
    %c0 = arith.constant 0 : index
    %c0_0 = arith.constant 0 : index
    %0 = vector.load %arg2[%c0, %c0_0] : memref<8x16xf32, #tpu.memory_space<vmem>>, vector<8x16xf32>
    %c0_1 = arith.constant 0 : index
    %c0_2 = arith.constant 0 : index
    %1 = vector.load %arg3[%c0_1, %c0_2] : memref<8x1xf32, #tpu.memory_space<vmem>>, vector<8x1xf32>
    %cst = arith.constant 9.99999971E-10 : f32
    %2 = vector.broadcast %cst : f32 to vector<8x1xf32>
    %3 = arith.addf %1, %2 : vector<8x1xf32>
    %cst_3 = arith.constant 1.000000e+00 : f32
    %4 = vector.broadcast %cst_3 : f32 to vector<8x1xf32>
    %5 = arith.divf %4, %3 : vector<8x1xf32>
    %6 = vector.broadcast %1 : vector<8x1xf32> to vector<8x16xf32>
    %7 = arith.mulf %6, %0 : vector<8x16xf32>
    %cst_4 = arith.constant 0.318309873 : f32
    %8 = vector.broadcast %cst_4 : f32 to vector<8x16xf32>
    %9 = arith.mulf %7, %8 : vector<8x16xf32>
    %cst_5 = arith.constant 5.000000e-01 : f32
    %10 = vector.broadcast %cst_5 : f32 to vector<8x16xf32>
    %11 = arith.addf %9, %10 : vector<8x16xf32>
    %12 = math.floor %11 : vector<8x16xf32>
    %cst_6 = arith.constant 3.140625 : f32
    %13 = vector.broadcast %cst_6 : f32 to vector<8x16xf32>
    %14 = arith.mulf %12, %13 : vector<8x16xf32>
    %15 = arith.subf %7, %14 : vector<8x16xf32>
    %cst_7 = arith.constant 9.67653584E-4 : f32
    %16 = vector.broadcast %cst_7 : f32 to vector<8x16xf32>
    %17 = arith.mulf %12, %16 : vector<8x16xf32>
    %18 = arith.subf %15, %17 : vector<8x16xf32>
    %19 = arith.mulf %18, %18 : vector<8x16xf32>
    %cst_8 = arith.constant -2.50521079E-8 : f32
    %20 = vector.broadcast %cst_8 : f32 to vector<8x16xf32>
    %21 = arith.mulf %20, %19 : vector<8x16xf32>
    %cst_9 = arith.constant 2.75573188E-6 : f32
    %22 = vector.broadcast %cst_9 : f32 to vector<8x16xf32>
    %23 = arith.addf %21, %22 : vector<8x16xf32>
    %24 = arith.mulf %23, %19 : vector<8x16xf32>
    %cst_10 = arith.constant -1.98412701E-4 : f32
    %25 = vector.broadcast %cst_10 : f32 to vector<8x16xf32>
    %26 = arith.addf %24, %25 : vector<8x16xf32>
    %27 = arith.mulf %26, %19 : vector<8x16xf32>
    %cst_11 = arith.constant 0.00833333377 : f32
    %28 = vector.broadcast %cst_11 : f32 to vector<8x16xf32>
    %29 = arith.addf %27, %28 : vector<8x16xf32>
    %30 = arith.mulf %29, %19 : vector<8x16xf32>
    %cst_12 = arith.constant -0.166666672 : f32
    %31 = vector.broadcast %cst_12 : f32 to vector<8x16xf32>
    %32 = arith.addf %30, %31 : vector<8x16xf32>
    %33 = arith.mulf %18, %19 : vector<8x16xf32>
    %34 = arith.mulf %33, %32 : vector<8x16xf32>
    %35 = arith.addf %18, %34 : vector<8x16xf32>
    %36 = arith.mulf %35, %35 : vector<8x16xf32>
    %37 = vector.broadcast %5 : vector<8x1xf32> to vector<8x16xf32>
    %38 = arith.mulf %37, %36 : vector<8x16xf32>
    %39 = arith.addf %0, %38 : vector<8x16xf32>
    %c0_13 = arith.constant 0 : index
    %c0_14 = arith.constant 0 : index
    %40 = vector.load %arg4[%c0_13, %c0_14] : memref<8x16xf32, #tpu.memory_space<vmem>>, vector<8x16xf32>
    tpu.vector_store %arg4[%c0_13, %c0_14], %39 {strides = array<i32>} : memref<8x16xf32, #tpu.memory_space<vmem>>, vector<8x16xf32>,
    return
  }
  func.func @transform_0(%arg0: i32, %arg1: i32) -> (i32, i32) {
    %c0_i32 = arith.constant 0 : i32
    return %arg0, %arg1 : i32, i32
  }
  func.func @transform_1(%arg0: i32, %arg1: i32) -> (i32, i32) {
    %c0_i32 = arith.constant 0 : i32
    %c0_i32_0 = arith.constant 0 : i32
    return %arg0, %c0_i32 : i32, i32
  }
  func.func @transform_2(%arg0: i32, %arg1: i32) -> (i32, i32) {
    %c0_i32 = arith.constant 0 : i32
    return %arg0, %arg1 : i32, i32
  }
}

</mosaic_0001>

<bundles_post_ra>
// kernel: tpu_custom_call.1
= control target key start
LH: loop header
LB: loop body
LE: loop exit
PB: predicated region body
PF: predicated region fallthrough
CT: control target
= control target key end

     0   :  { %s130_s0 = inlined_call_operand.vmem [shape: f32[8,16], index: 0, kind: input, shape index: {}]   ;;  %s131_s1 = inlined_call_operand.vmem [shape: f32[8,1], index: 1, kind: input, shape index: {}]   ;;  %s132_s2 = inlined_call_operand.hbm [shape: f32[8,16], index: 2, kind: output, shape index: {}]  }
   0x1   :  { %v13_v0 = vld [vmem:[%s131_s1] sm:$0xff] }
   0x2   :  { %7 = vsyncpa [#allocation3], 0  ;;  %v95_v1 = vmov 0   ;;  %v14_v2 = vadd.f32 1e-09, %v13_v0  ;;  %v12_v4 = vld [vmem:[%s130_s0] sm:$0xff] }
   0x3   :  { %68 = vset.pattern.permute.xlu0 %v95_v1  ;;  %s96_s0 = smov [#allocation2]   ;;  %vm50_vm0 = vcmask 130048  }
   0x4   :  { %19 = vperm.xlu0 %68, %v13_v0   ;;  %69 = vrcp.f32 %v14_v2  ;;  %s58_s1 = sshll.u32 %s96_s0, 4  ;;  %s59_s1 = int_to_ptr.vmem [resolvable:$true] %s58_s1 }
   0x5   :  { %s71_s13 = scalar_lea.vmem %s59_s1, 128  ;;  %p76_p1 = scmp.lt.s32.totalorder %s59_s1, %s59_s1 }
   0x6   :  { %p72_p0 = scmp.ne.s32.totalorder %s59_s1, %s71_s13  ;;  %p77_p2 = scmp.lt.s32.totalorder %s71_s13, %s71_s13 }
   0x8   :  { %p78_p3 = por %p77_p2, %p76_p1 }
   0xa   :  { %p79_p4 = pnand %p78_p3, %p72_p0 }
   0xe   :  { %v70_v3 = vpop.eup %69 }
   0xf   :  { %45 = vperm.xlu0 %68, %v70_v3  }
  0x83   :  { %v20_v5 = vpop.permute.xlu0 %19 }
  0x84   :  { %v22_v6 = vmul.f32 %v20_v5, %v12_v4 }
  0x86   :  { %v23_v7 = vmul.f32 0.31830987, %v22_v6 }
  0x88   :  { %v24_v8 = vadd.f32 0.5, %v23_v7 }
  0x8a   :  { %v25_v9 = vfloor.f32 %v24_v8 }
  0x8c   :  { %v26_v10 = vmul.f32 3.140625, %v25_v9  ;;  %v28_v12 = vmul.f32 0.0009676536, %v25_v9 }
  0x8e   :  { %v27_v11 = vsub.f32 %v22_v6, %v26_v10  ;;  %v46_v27 = vpop.permute.xlu0 %45 }
  0x90   :  { %v29_v13 = vsub.f32 %v27_v11, %v28_v12 }
  0x92   :  { %v30_v14 = vmul.f32 %v29_v13, %v29_v13 }
  0x94   :  { %v31_v15 = vmul.f32 -2.5052108e-08, %v30_v14  ;;  %v39_v23 = vmul.f32 %v30_v14, %v29_v13 }
  0x96   :  { %v32_v16 = vadd.f32 2.7557319e-06, %v31_v15 }
  0x98   :  { %v33_v17 = vmul.f32 %v32_v16, %v30_v14 }
  0x9a   :  { %v34_v18 = vadd.f32 -0.0001984127, %v33_v17 }
  0x9c   :  { %v35_v19 = vmul.f32 %v34_v18, %v30_v14 }
  0x9e   :  { %v36_v20 = vadd.f32 0.008333334, %v35_v19 }
  0xa0   :  { %v37_v21 = vmul.f32 %v36_v20, %v30_v14 }
  0xa2   :  { %v38_v22 = vadd.f32 -0.16666667, %v37_v21 }
  0xa4   :  { %v40_v24 = vmul.f32 %v39_v23, %v38_v22 }
  0xa6   :  { %v41_v25 = vadd.f32 %v40_v24, %v29_v13 }
  0xa8   :  { %v42_v26 = vmul.f32 %v41_v25, %v41_v25 }
  0xaa   :  { %v48_v28 = vmul.f32 %v46_v27, %v42_v26 }
  0xac   :  { %v49_v29 = vadd.f32 %v48_v28, %v12_v4 }
  0xae   :  { %51 = vst.msk [vmem:[#allocation2] sm:$0xff] %vm50_vm0, %v49_v29 }
  0xaf   :  { %82 = shalt.err (!%p79_p4)
}
  0xb0   :  { %s83_s16 = scalar_lea.hbm %s132_s2, 128 }
  0xb1   :  { %p84_p5 = scmp.ne.s32.totalorder %s132_s2, %s83_s16  ;;  %p87_p6 = scmp.lt.u32.totalorder %s83_s16, %s132_s2 }
  0xb3   :  { %p89_p7 = pnand %p87_p6, %p84_p5 }
  0xb5   :  { %92 = shalt.err (!%p89_p7)
}
  0xb6   :  { %61 = dma.vmem_to_hbm [thread:$0]  %s59_s1, 128, %s132_s2, [#allocation3]  }
  0xb7   :  { %93 = dma.done.wait [#allocation3], 128  }
  0xb8   :  { %94 = vsyncadd [#allocation3], 4294967168 }
  0xb9   :  { %65 = vsyncpa [#allocation3], 1 }

</bundles_post_ra>
